<compile_context>
chip_gen: v6e
topology: v6e:2x2x1
jax: 0.10.0
libtpu: 0.0.40
codegen_flags: <defaults>
</compile_context>

<pallas_src>
import jax
import jax.numpy as jnp
from jax.experimental import pallas as pl
from jax.experimental.pallas import tpu as pltpu

LANES = 128  # lane-dense output width


def dqn_kernel(x_ref, w1_ref, b1_ref, w2_ref, b2_ref, w3_ref, b3_ref, o_ref):
    # Cast the x tile once to the (bf16) weight dtype for the MXU; accumulate
    # in f32 and keep the VPU epilogue (bias add + ReLU) in f32.
    x = x_ref[...].astype(w1_ref.dtype)
    # fc1 + ReLU
    h1 = jnp.dot(x, w1_ref[...], preferred_element_type=jnp.float32)
    h1 = jnp.maximum(h1 + b1_ref[...], 0.0)
    # fc2 + ReLU
    h2 = jnp.dot(h1.astype(w2_ref.dtype), w2_ref[...],
                 preferred_element_type=jnp.float32)
    h2 = jnp.maximum(h2 + b2_ref[...], 0.0)
    # fc3 (no activation), written to a lane-dense (TB, 128) block
    o = jnp.dot(h2.astype(w3_ref.dtype), w3_ref[...],
                preferred_element_type=jnp.float32)
    o_ref[...] = (o + b3_ref[...]).astype(o_ref.dtype)


def dqn_forward(x, params, *, tb=512):
    """x: (B, state_dim) float32. params: dict of w1,b1,w2,b2,w3,b3."""
    w1, b1, w2, b2, w3, b3 = (params[k] for k in ("w1", "b1", "w2", "b2", "w3", "b3"))
    B, state_dim = x.shape
    action_dim = w3.shape[1]

    # --- lane-dense output: zero-pad fc3 to a multiple of 128 lanes (exact) ---
    n_pad = pl.cdiv(max(action_dim, LANES), LANES) * LANES
    w3p = jnp.zeros((w3.shape[0], n_pad), w3.dtype).at[:, :action_dim].set(w3)
    b3p = jnp.zeros((1, n_pad), b3.dtype).at[:, :action_dim].set(b3)

    # --- batch tiling: multiple of 8 sublanes, up to `tb` rows per grid step ---
    b8 = pl.cdiv(B, 8) * 8
    TB = min(tb, b8)
    B_pad = pl.cdiv(b8, TB) * TB
    if B_pad != B:
        x = jnp.pad(x, ((0, B_pad - B), (0, 0)))
    nb = B_pad // TB

    # Weights / biases stay VMEM-resident across the whole grid.
    resident = lambda a: pl.BlockSpec(a.shape, lambda i: (0,) * a.ndim)

    flops = 2 * B_pad * (state_dim * w1.shape[1]
                         + w1.shape[1] * w2.shape[1]
                         + w2.shape[1] * n_pad)
    bytes_accessed = (
        x.size * x.dtype.itemsize
        + B_pad * n_pad * 4
        + sum(int(a.size) * a.dtype.itemsize for a in (w1, b1, w2, b2, w3p, b3p))
    )

    out = pl.pallas_call(
        dqn_kernel,
        out_shape=jax.ShapeDtypeStruct((B_pad, n_pad), jnp.float32),
        grid_spec=pltpu.PrefetchScalarGridSpec(
            num_scalar_prefetch=0,
            grid=(nb,),
            in_specs=[
                pl.BlockSpec((TB, state_dim), lambda i: (i, 0)),  # x streams over batch
                resident(w1), resident(b1),
                resident(w2), resident(b2),
                resident(w3p), resident(b3p),
            ],
            out_specs=pl.BlockSpec((TB, n_pad), lambda i: (i, 0)),
        ),
        compiler_params=pltpu.CompilerParams(
            dimension_semantics=("parallel",),  # v7x megacore sharding over batch tiles
        ),
        cost_estimate=pl.CostEstimate(
            flops=flops, transcendentals=0, bytes_accessed=bytes_accessed
        ),
    )(x, w1, b1, w2, b2, w3p, b3p)

    return out[:B, :action_dim]


def init_params(key, state_dim, action_dim, *, weight_dtype=jnp.bfloat16):
    """Init mimicking PyTorch nn.Linear default U(-1/sqrt(fan_in), +).

    Weights stored bf16 (MXU operands); biases stay f32 (f32 epilogue)."""
    dims = [(state_dim, 64), (64, 32), (32, action_dim)]
    params = {}
    for i, (fan_in, fan_out) in enumerate(dims, start=1):
        key, kw, kb = jax.random.split(key, 3)
        bound = 1.0 / jnp.sqrt(jnp.float32(fan_in))
        params[f"w{i}"] = jax.random.uniform(
            kw, (fan_in, fan_out), jnp.float32, minval=-bound, maxval=bound
        ).astype(weight_dtype)
        params[f"b{i}"] = jax.random.uniform(
            kb, (1, fan_out), jnp.float32, minval=-bound, maxval=bound
        )
    return params


def reference_forward(x, params):
    """Pure-JAX f32 reference (weights upcast to f32)."""
    w1 = params["w1"].astype(jnp.float32)
    w2 = params["w2"].astype(jnp.float32)
    w3 = params["w3"].astype(jnp.float32)
    h1 = jnp.maximum(x @ w1 + params["b1"], 0.0)
    h2 = jnp.maximum(h1 @ w2 + params["b2"], 0.0)
    return h2 @ w3 + params["b3"]


if __name__ == "__main__":
    key = jax.random.PRNGKey(0)
    state_dim, action_dim = 16, 4
    params = init_params(key, state_dim, action_dim)

    # Small test (single grid step).
    key, kx = jax.random.split(key)
    x_small = jax.random.normal(kx, (8, state_dim), jnp.float32)
    out_small = jax.block_until_ready(dqn_forward(x_small, params))
    ref_small = reference_forward(x_small, params)
    assert out_small.shape == (8, action_dim)
    # bf16 operands + f32 accumulation -> loosened tolerance vs f32 reference.
    assert jnp.allclose(out_small, ref_small, atol=3e-2, rtol=3e-2), "mismatch (small)"

    # Slightly larger, non-multiple-of-8 batch to exercise the batch grid,
    # padding and megacore-parallel path.
    key, kx = jax.random.split(key)
    x_big = jax.random.normal(kx, (260, state_dim), jnp.float32)
    out_big = jax.block_until_ready(dqn_forward(x_big, params, tb=128))
    ref_big = reference_forward(x_big, params)
    assert out_big.shape == (260, action_dim)
    assert jnp.allclose(out_big, ref_big, atol=3e-2, rtol=3e-2), "mismatch (big)"

    print("KERNEL_OK")
</pallas_src>

<mosaic_0001>
module attributes {stable_mosaic.version = 11 : i64} {
  func.func @dqn_kernel(%arg0: i32, %arg1: memref<8x16xf32, #tpu.memory_space<vmem>>, %arg2: memref<16x64xbf16, #tpu.memory_space<vmem>>, %arg3: memref<1x64xf32, #tpu.memory_space<vmem>>, %arg4: memref<64x32xbf16, #tpu.memory_space<vmem>>, %arg5: memref<1x32xf32, #tpu.memory_space<vmem>>, %arg6: memref<32x128xbf16, #tpu.memory_space<vmem>>, %arg7: memref<1x128xf32, #tpu.memory_space<vmem>>, %arg8: memref<8x128xf32, #tpu.memory_space<vmem>>) attributes {dimension_semantics = [#tpu.dimension_semantics<parallel>], iteration_bounds = array<i64: 1>, scalar_prefetch = 0 : i64, scratch_operands = 0 : i64, tpu.core_type = #tpu.core_type<tc>, window_params = [{transform_indices = @transform_0, window_bounds = array<i64: 8, 16>}, {pipeline_mode = #tpu.pipeline_mode<synchronous>, transform_indices = @transform_1, window_bounds = array<i64: 16, 64>}, {pipeline_mode = #tpu.pipeline_mode<synchronous>, transform_indices = @transform_2, window_bounds = array<i64: 1, 64>}, {pipeline_mode = #tpu.pipeline_mode<synchronous>, transform_indices = @transform_3, window_bounds = array<i64: 64, 32>}, {pipeline_mode = #tpu.pipeline_mode<synchronous>, transform_indices = @transform_4, window_bounds = array<i64: 1, 32>}, {pipeline_mode = #tpu.pipeline_mode<synchronous>, transform_indices = @transform_5, window_bounds = array<i64: 32, 128>}, {pipeline_mode = #tpu.pipeline_mode<synchronous>, transform_indices = @transform_6, window_bounds = array<i64: 1, 128>}, {transform_indices = @transform_7, window_bounds = array<i64: 8, 128>}]} {
    %c0 = arith.constant 0 : index
    %c0_0 = arith.constant 0 : index
    %0 = vector.load %arg1[%c0, %c0_0] : memref<8x16xf32, #tpu.memory_space<vmem>>, vector<8x16xf32>
    %1 = arith.truncf %0 : vector<8x16xf32> to vector<8x16xbf16>
    %c0_1 = arith.constant 0 : index
    %c0_2 = arith.constant 0 : index
    %2 = vector.load %arg2[%c0_1, %c0_2] : memref<16x64xbf16, #tpu.memory_space<vmem>>, vector<16x64xbf16>
    %cst = arith.constant dense<0.000000e+00> : vector<8x64xf32>
    %3 = tpu.matmul %1, %2, %cst {dimension_numbers = #tpu.dot_dimension_numbers<[1], [0], [0], [1], [0, 0, 1, 1], [], []>} : vector<8x16xbf16>, vector<16x64xbf16>, vector<8x64xf32> -> vector<8x64xf32>
    %c0_3 = arith.constant 0 : index
    %c0_4 = arith.constant 0 : index
    %4 = vector.load %arg3[%c0_3, %c0_4] : memref<1x64xf32, #tpu.memory_space<vmem>>, vector<1x64xf32>
    %5 = vector.broadcast %4 : vector<1x64xf32> to vector<8x64xf32>
    %6 = arith.addf %3, %5 : vector<8x64xf32>
    %cst_5 = arith.constant 0.000000e+00 : f32
    %7 = vector.broadcast %cst_5 : f32 to vector<8x64xf32>
    %8 = arith.maximumf %6, %7 : vector<8x64xf32>
    %9 = arith.truncf %8 : vector<8x64xf32> to vector<8x64xbf16>
    %c0_6 = arith.constant 0 : index
    %c0_7 = arith.constant 0 : index
    %10 = vector.load %arg4[%c0_6, %c0_7] : memref<64x32xbf16, #tpu.memory_space<vmem>>, vector<64x32xbf16>
    %cst_8 = arith.constant dense<0.000000e+00> : vector<8x32xf32>
    %11 = tpu.matmul %9, %10, %cst_8 {dimension_numbers = #tpu.dot_dimension_numbers<[1], [0], [0], [1], [0, 0, 1, 1], [], []>} : vector<8x64xbf16>, vector<64x32xbf16>, vector<8x32xf32> -> vector<8x32xf32>
    %c0_9 = arith.constant 0 : index
    %c0_10 = arith.constant 0 : index
    %12 = vector.load %arg5[%c0_9, %c0_10] : memref<1x32xf32, #tpu.memory_space<vmem>>, vector<1x32xf32>
    %13 = vector.broadcast %12 : vector<1x32xf32> to vector<8x32xf32>
    %14 = arith.addf %11, %13 : vector<8x32xf32>
    %cst_11 = arith.constant 0.000000e+00 : f32
    %15 = vector.broadcast %cst_11 : f32 to vector<8x32xf32>
    %16 = arith.maximumf %14, %15 : vector<8x32xf32>
    %17 = arith.truncf %16 : vector<8x32xf32> to vector<8x32xbf16>
    %c0_12 = arith.constant 0 : index
    %c0_13 = arith.constant 0 : index
    %18 = vector.load %arg6[%c0_12, %c0_13] : memref<32x128xbf16, #tpu.memory_space<vmem>>, vector<32x128xbf16>
    %cst_14 = arith.constant dense<0.000000e+00> : vector<8x128xf32>
    %19 = tpu.matmul %17, %18, %cst_14 {dimension_numbers = #tpu.dot_dimension_numbers<[1], [0], [0], [1], [0, 0, 1, 1], [], []>} : vector<8x32xbf16>, vector<32x128xbf16>, vector<8x128xf32> -> vector<8x128xf32>
    %c0_15 = arith.constant 0 : index
    %c0_16 = arith.constant 0 : index
    %20 = vector.load %arg7[%c0_15, %c0_16] : memref<1x128xf32, #tpu.memory_space<vmem>>, vector<1x128xf32>
    %21 = vector.broadcast %20 : vector<1x128xf32> to vector<8x128xf32>
    %22 = arith.addf %19, %21 : vector<8x128xf32>
    %c0_17 = arith.constant 0 : index
    %c0_18 = arith.constant 0 : index
    %23 = vector.load %arg8[%c0_17, %c0_18] : memref<8x128xf32, #tpu.memory_space<vmem>>, vector<8x128xf32>
    tpu.vector_store %arg8[%c0_17, %c0_18], %22 {strides = array<i32>} : memref<8x128xf32, #tpu.memory_space<vmem>>, vector<8x128xf32>,
    return
  }
  func.func @transform_0(%arg0: i32) -> (i32, i32) {
    %c0_i32 = arith.constant 0 : i32
    %c0_i32_0 = arith.constant 0 : i32
    return %arg0, %c0_i32 : i32, i32
  }
  func.func @transform_1(%arg0: i32) -> (i32, i32) {
    %c0_i32 = arith.constant 0 : i32
    %c0_i32_0 = arith.constant 0 : i32
    %c0_i32_1 = arith.constant 0 : i32
    return %c0_i32, %c0_i32_0 : i32, i32
  }
  func.func @transform_2(%arg0: i32) -> (i32, i32) {
    %c0_i32 = arith.constant 0 : i32
    %c0_i32_0 = arith.constant 0 : i32
    %c0_i32_1 = arith.constant 0 : i32
    return %c0_i32, %c0_i32_0 : i32, i32
  }
  func.func @transform_3(%arg0: i32) -> (i32, i32) {
    %c0_i32 = arith.constant 0 : i32
    %c0_i32_0 = arith.constant 0 : i32
    %c0_i32_1 = arith.constant 0 : i32
    return %c0_i32, %c0_i32_0 : i32, i32
  }
  func.func @transform_4(%arg0: i32) -> (i32, i32) {
    %c0_i32 = arith.constant 0 : i32
    %c0_i32_0 = arith.constant 0 : i32
    %c0_i32_1 = arith.constant 0 : i32
    return %c0_i32, %c0_i32_0 : i32, i32
  }
  func.func @transform_5(%arg0: i32) -> (i32, i32) {
    %c0_i32 = arith.constant 0 : i32
    %c0_i32_0 = arith.constant 0 : i32
    %c0_i32_1 = arith.constant 0 : i32
    return %c0_i32, %c0_i32_0 : i32, i32
  }
  func.func @transform_6(%arg0: i32) -> (i32, i32) {
    %c0_i32 = arith.constant 0 : i32
    %c0_i32_0 = arith.constant 0 : i32
    %c0_i32_1 = arith.constant 0 : i32
    return %c0_i32, %c0_i32_0 : i32, i32
  }
  func.func @transform_7(%arg0: i32) -> (i32, i32) {
    %c0_i32 = arith.constant 0 : i32
    %c0_i32_0 = arith.constant 0 : i32
    return %arg0, %c0_i32 : i32, i32
  }
}

</mosaic_0001>

<bundles_post_ra>
// kernel: tpu_custom_call.1
= control target key start
LH: loop header
LB: loop body
LE: loop exit
PB: predicated region body
PF: predicated region fallthrough
CT: control target
= control target key end

     0   :  { %v339_v1 = vmov 0.0   ;;  %vm45_vm0 = vcmask 130048   ;;  %vm340_vm1 = vmmov 0   ;;  %s418_s0 = inlined_call_operand.vmem [shape: f32[8,16], index: 0, kind: input, shape index: {}]   ;;  %s419_s1 = inlined_call_operand.vmem [shape: bf16[16,64], index: 1, kind: input, shape index: {}]   ;;  %s420_s2 = inlined_call_operand.vmem [shape: f32[1,64], index: 2, kind: input, shape index: {}]   ;;  %s421_s3 = inlined_call_operand.vmem [shape: bf16[64,32], index: 3, kind: input, shape index: {}]   ;;  %s422_s4 = inlined_call_operand.vmem [shape: f32[1,32], index: 4, kind: input, shape index: {}]   ;;  %s423_s5 = inlined_call_operand.vmem [shape: bf16[32,128], index: 5, kind: input, shape index: {}]   ;;  %s424_s6 = inlined_call_operand.vmem [shape: f32[1,128], index: 6, kind: input, shape index: {}]   ;;  %s425_s7 = inlined_call_operand.hbm [shape: f32[8,128], index: 7, kind: output, shape index: {}]  }
   0x1   :  { %v310_v0 = vld [vmem:[%s419_s1] sm:$0xff]   ;;  %281 = vmatprep.subr.bf16.mxu0 %v339_v1  ;;  %287 = vmatprep.subr.bf16.mxu1 %v339_v1  ;;  %v311_v3 = vld [vmem:[%s421_s3 + $0x18] sm:$0xff]   ;;  %v312_v5 = vld [vmem:[%s421_s3 + $0x10] sm:$0xff]  }
   0x2   :  { %v28_v2 = vld [vmem:[%s418_s0] sm:$0xff]  ;;  %282 = vmatpush3.bf16.msra.mxu0 %v310_v0  ;;  %283 = vmatprep.mubr.msk.bf16.mxu0 %vm340_vm1, %v339_v1 }
   0x3   :  { %v29_v4 = vpack.c.bf16 %v28_v2, %v28_v2  ;;  %288 = vmatpush3.bf16.msra.mxu1 %v311_v3  ;;  %295 = vmatprep.mubr.msk.bf16.mxu1 %vm340_vm1, %v339_v1 }
   0x4   :  { %289 = vmatprep.subr.bf16.mxu1 %v339_v1  ;;  %299 = vmatprep.subr.bf16.mxu0 %v339_v1 }
   0x5   :  { %284 = vmatmul.mubr.msk.bf16.vlgmr.msra.gmra.mxu0 %vm45_vm0, %v29_v4 }
   0x6   :  { %303 = vmatprep.mubr.msk.bf16.mxu0 %vm340_vm1, %v339_v1 }
   0x7   :  { %12 = vsyncpa [#allocation3], 0  ;;  %290 = vmatpush3.bf16.msra.mxu1 %v312_v5  ;;  %v313_v6 = vld [vmem:[%s421_s3 + $0x8] sm:$0xff]   ;;  %v314_v7 = vld [vmem:[%s421_s3] sm:$0xff]   ;;  %vm130_vm2 = vcmask 523264   ;;  %vm199_vm3 = vcmask 261120  }
   0x8   :  { %291 = vmatprep.subr.bf16.mxu1 %v339_v1  ;;  %v315_v8 = vld [vmem:[%s423_s5 + $0x8] sm:$0xff]   ;;  %v258_v9 = vld [vmem:[%s420_s2] ss:$0 sm:$0xff]  ;;  %s341_s19 = smov [#allocation2]  }
   0x9   :  { %300 = vmatpush3.bf16.msra.mxu0 %v315_v8  ;;  %v316_v17 = vld [vmem:[%s423_s5] sm:$0xff]   ;;  %s250_s5 = sshll.u32 %s341_s19, 4  ;;  %s251_s5 = int_to_ptr.vmem [resolvable:$true] %s250_s5 }
   0xa   :  { %301 = vmatprep.subr.bf16.mxu0 %v339_v1  ;;  %v261_v18 = vld [vmem:[%s422_s4] ss:$0 sm:$0xff]  ;;  %s317_s4 = scalar_lea.vmem %s251_s5, 128  ;;  %p322_p1 = scmp.lt.s32.totalorder %s251_s5, %s251_s5 }
   0xb   :  { %292 = vmatpush3.bf16.msra.mxu1 %v313_v6  ;;  %v267_v26 = vld [vmem:[%s424_s6] ss:$0 sm:$0xff]  ;;  %p318_p0 = scmp.ne.s32.totalorder %s251_s5, %s317_s4  ;;  %p323_p2 = scmp.lt.s32.totalorder %s317_s4, %s317_s4 }
   0xc   :  { %293 = vmatprep.subr.bf16.mxu1 %v339_v1 }
   0xd   :  { %302 = vmatpush3.bf16.msra.mxu0 %v316_v17  ;;  %p324_p3 = por %p323_p2, %p322_p1 }
   0xf   :  { %294 = vmatpush3.bf16.msra.mxu1 %v314_v7  ;;  %p325_p4 = pnand %p324_p3, %p318_p0 }
  0xc5   :  { %v83_v10 = vpop.f32.mrf.mxu0 }
  0xc6   :  { %v84_v11 = vadd.f32 %v258_v9, %v83_v10 }
  0xc7   :  { %v285_v12 = vpop.f32.mrf.mxu0 }
  0xc8   :  { %v89_v13 = vmax.f32 %v84_v11, 0.0 }
  0xc9   :  { %v86_v14 = vpop.f32.mrf.mxu0 }
  0xca   :  { %v90_v15 = vpack.c.bf16 %v89_v13, %v89_v13 }
  0xcb   :  { %v286_v16 = vpop.f32.mrf.mxu0 }
  0xcc   :  { %296 = vmatmul.mubr.msk.bf16.vlgmr.msra.gmra.mxu1 %vm130_vm2, %v90_v15 }
 0x18c   :  { %v168_v19 = vpop.f32.mrf.mxu1 }
 0x18d   :  { %v169_v20 = vadd.f32 %v261_v18, %v168_v19 }
 0x18e   :  { %v297_v21 = vpop.f32.mrf.mxu1 }
 0x18f   :  { %v174_v22 = vmax.f32 %v169_v20, 0.0 }
 0x190   :  { %v171_v23 = vpop.f32.mrf.mxu1 }
 0x191   :  { %v175_v24 = vpack.c.bf16 %v174_v22, %v174_v22 }
 0x192   :  { %v298_v25 = vpop.f32.mrf.mxu1 }
 0x193   :  { %304 = vmatmul.mubr.msk.bf16.vlgmr.msra.gmra.mxu0 %vm199_vm3, %v175_v24 }
 0x253   :  { %v237_v27 = vpop.f32.mrf.mxu0 }
 0x254   :  { %v238_v28 = vadd.f32 %v267_v26, %v237_v27 }
 0x255   :  { %v305_v29 = vpop.f32.mrf.mxu0 }
 0x256   :  { %243 = vst [vmem:[#allocation2] sm:$0xff] %v238_v28 }
 0x257   :  { %v240_v30 = vpop.f32.mrf.mxu0 }
 0x258   :  { %328 = shalt.err (!%p325_p4)
}
 0x259   :  { %253 = dma.vmem_to_hbm [thread:$0]  %s251_s5, 128, %s425_s7, [#allocation3]   ;;  %v306_v31 = vpop.f32.mrf.mxu0 }
 0x25a   :  { %337 = dma.done.wait [#allocation3], 128  }
 0x25b   :  { %338 = vsyncadd [#allocation3], 4294967168 }
 0x25c   :  { %257 = vsyncpa [#allocation3], 1 }

</bundles_post_ra>
